<compile_context>
chip_gen: v6e
topology: v6e:2x2x1
jax: 0.10.0
libtpu: 0.0.40
codegen_flags: <defaults>
</compile_context>

<pallas_src>
import jax
import jax.numpy as jnp
from jax.experimental import pallas as pl
from jax.experimental.pallas import tpu as pltpu


def _round_up(x: int, m: int) -> int:
    return ((x + m - 1) // m) * m


def _make_chamfer_kernel(tn: int, tm: int, chunk: int):
    """Kernel for one (TN, TM) tile of the pairwise squared-distance matrix.

    Refs:
      p_ref : (1, TN, 8)      augmented a1 tile (resident across j)
      q_ref : (1, 8, TM)      augmented a2 tile (streamed along j)
      d1_ref: (1, n_i, TN)    per-batch output, row i written once at j == n_j-1
      d2_ref: (1, n_j, TM)    per-batch output, row j written once at i == n_i-1
      m1_acc: (TN, CHUNK)     dist1 running-min bins (accumulated over j)
      d2_acc: (n_j, 8, TM)    dist2 running-min bins (accumulated over i)
    """
    n_chunks = tm // chunk

    def kernel(p_ref, q_ref, d1_ref, d2_ref, m1_acc, d2_acc):
        i = pl.program_id(1)
        j = pl.program_id(2)
        n_i = pl.num_programs(1)
        n_j = pl.num_programs(2)

        d2j = d2_acc.at[j]                       # (8, TM) slot for this M tile

        # ---- init accumulators to +inf; updates below are unconditional ----
        @pl.when(j == 0)                          # new row block (b, i)
        def _():
            m1_acc[...] = jnp.full((tn, chunk), jnp.inf, jnp.float32)

        @pl.when(i == 0)                          # first visit of column block (b, j)
        def _():
            d2j[...] = jnp.full((8, tm), jnp.inf, jnp.float32)

        p = p_ref[0]                              # (TN, 8)

        # ---- single pass: matmul a lane chunk, immediately min-accumulate ----
        for c in range(n_chunks):                 # static unroll (n_chunks small)
            lo = c * chunk
            qc = q_ref[0, :, lo:lo + chunk]       # (8, CHUNK), static lane slice
            # Squared distances on the MXU: d[n, m] = |p_n|^2 + |q_m|^2 - 2<p_n, q_m>.
            dc = jnp.dot(p, qc,
                         preferred_element_type=jnp.float32,
                         precision=jax.lax.Precision.HIGHEST)   # (TN, CHUNK)
            # dist1 partial: elementwise VPU min into lane-structured bins.
            m1_acc[...] = jnp.minimum(m1_acc[...], dc)
            # dist2 partial: fold sublane groups (vreg-wise mins, no XLU).
            d2_part = jnp.min(dc.reshape(tn // 8, 8, chunk), axis=0)   # (8, CHUNK)
            d2j[:, lo:lo + chunk] = jnp.minimum(d2j[:, lo:lo + chunk], d2_part)

        # ---- finalize dist1 row block: one cross-lane reduce per (b, i) ----
        @pl.when(j == n_j - 1)
        def _():
            row_min = jnp.min(m1_acc[...], axis=1)                     # (TN,)
            d1_ref[0, i, :] = jnp.sqrt(jnp.maximum(row_min, 0.0))

        # ---- finalize dist2 column block: one sublane reduce per (b, j) ----
        @pl.when(i == n_i - 1)
        def _():
            col_min = jnp.min(d2j[...], axis=0)                        # (TM,)
            d2_ref[0, j, :] = jnp.sqrt(jnp.maximum(col_min, 0.0))

    return kernel


def l1_chamfer_loss(array1, array2, *, tile_n: int = 1024, tile_m: int = 2048):
    """array1: (B, N, 3), array2: (B, M, 3) -> scalar L1 Chamfer loss."""
    assert tile_n % 128 == 0 and tile_m % 128 == 0
    B, N, D = array1.shape
    B2, M, D2 = array2.shape
    assert B == B2 and D == 3 and D2 == 3

    f32 = jnp.float32
    a1 = array1.astype(f32)
    a2 = array2.astype(f32)

    # Tile sizes: multiples of 128, clamped to the (padded) problem size.
    tn = min(tile_n, _round_up(N, 128))
    tm = min(tile_m, _round_up(M, 128))
    n_pad = _round_up(N, tn)
    m_pad = _round_up(M, tm)
    n_i = n_pad // tn
    n_j = m_pad // tm

    # Lane-chunk width for the in-kernel single-pass consumption.
    chunk = 512
    while tm % chunk:
        chunk //= 2

    # Pad each cloud with copies of its own first point: duplicates never
    # change the nearest-neighbour minima; padded rows are sliced off below.
    if n_pad != N:
        a1 = jnp.concatenate(
            [a1, jnp.broadcast_to(a1[:, :1], (B, n_pad - N, 3))], axis=1)
    if m_pad != M:
        a2 = jnp.concatenate(
            [a2, jnp.broadcast_to(a2[:, :1], (B, m_pad - M, 3))], axis=1)

    # Coordinate augmentation (K = 5 padded to 8): P @ Q IS the squared
    # distance, so the kernel has no O(N*M) elementwise epilogue.
    n1 = jnp.sum(a1 * a1, axis=-1, keepdims=True)                       # (B, Np, 1)
    p_aug = jnp.concatenate(
        [a1, n1, jnp.ones_like(n1), jnp.zeros((B, n_pad, 3), f32)],
        axis=-1)                                                        # (B, Np, 8)

    a2_t = jnp.swapaxes(a2, 1, 2)                                       # (B, 3, Mp)
    n2 = jnp.sum(a2 * a2, axis=-1)[:, None, :]                          # (B, 1, Mp)
    q_aug = jnp.concatenate(
        [-2.0 * a2_t, jnp.ones_like(n2), n2, jnp.zeros((B, 3, m_pad), f32)],
        axis=1)                                                         # (B, 8, Mp)

    cost = pl.CostEstimate(
        flops=int(2 * B * n_pad * m_pad * 8),
        transcendentals=0,
        bytes_accessed=int(4 * (B * n_pad * 8          # P tiles (once per i)
                                + B * n_i * 8 * m_pad  # Q tiles (re-streamed per i)
                                + B * n_pad + B * m_pad)),
    )

    kernel = _make_chamfer_kernel(tn, tm, chunk)

    d1, d2 = pl.pallas_call(
        kernel,
        out_shape=(
            jax.ShapeDtypeStruct((B, n_i, tn), f32),
            jax.ShapeDtypeStruct((B, n_j, tm), f32),
        ),
        grid=(B, n_i, n_j),
        in_specs=[
            pl.BlockSpec((1, tn, 8), lambda b, i, j: (b, i, 0)),   # resident over j
            pl.BlockSpec((1, 8, tm), lambda b, i, j: (b, 0, j)),   # streamed operand
        ],
        out_specs=(
            pl.BlockSpec((1, n_i, tn), lambda b, i, j: (b, 0, 0)),  # per-batch resident
            pl.BlockSpec((1, n_j, tm), lambda b, i, j: (b, 0, 0)),  # per-batch resident
        ),
        scratch_shapes=[
            pltpu.VMEM((tn, chunk), f32),       # dist1 running-min bins
            pltpu.VMEM((n_j, 8, tm), f32),      # dist2 running-min bins (per M tile)
        ],
        compiler_params=pltpu.CompilerParams(
            # Batch axis shards across TensorCores (v7x megacore); both tile
            # axes carry running-min accumulators -> "arbitrary".
            dimension_semantics=("parallel", "arbitrary", "arbitrary"),
            vmem_limit_bytes=32 * 1024 * 1024,
        ),
        cost_estimate=cost,
    )(p_aug, q_aug)

    d1 = d1.reshape(B, n_pad)[:, :N]   # sqrt(min_j ||a1_i - a2_j||^2)
    d2 = d2.reshape(B, m_pad)[:, :M]   # sqrt(min_i ||a1_i - a2_j||^2)
    return (jnp.mean(d1) + jnp.mean(d2)) / 2.0


def _reference_loss(array1, array2):
    # Pure-JAX reference (same math as the PyTorch module).
    diff = array1[:, :, None, :] - array2[:, None, :, :]      # (B, N, M, 3)
    sq = jnp.sum(diff * diff, axis=-1)                        # (B, N, M)
    dist1 = jnp.min(sq, axis=2)                               # (B, N)
    dist2 = jnp.min(sq, axis=1)                               # (B, M)
    return (jnp.mean(jnp.sqrt(dist1)) + jnp.mean(jnp.sqrt(dist2))) / 2.0


if __name__ == "__main__":
    key = jax.random.PRNGKey(0)
    k1, k2 = jax.random.split(key)
    B, N, M = 2, 200, 160          # deliberately not multiples of 128 (pad path)
    array1 = jax.random.normal(k1, (B, N, 3), dtype=jnp.float32)
    array2 = jax.random.normal(k2, (B, M, 3), dtype=jnp.float32)

    ref = _reference_loss(array1, array2)

    # Small tiles -> multi-tile grid exercises the scratch accumulators,
    # padding, init (+inf) and finalize (reduce + sqrt) paths.
    loss_tiled = jax.jit(
        lambda a, b: l1_chamfer_loss(a, b, tile_n=128, tile_m=128))(array1, array2)
    loss_tiled = jax.block_until_ready(loss_tiled)
    assert jnp.allclose(loss_tiled, ref, rtol=1e-4, atol=1e-4), (loss_tiled, ref)

    # Default (large) tile sizes -> single tile per cloud at this small size.
    loss_default = jax.jit(l1_chamfer_loss)(array1, array2)
    loss_default = jax.block_until_ready(loss_default)
    assert jnp.allclose(loss_default, ref, rtol=1e-4, atol=1e-4), (loss_default, ref)

    print("KERNEL_OK")
</pallas_src>

<mosaic_0001>
module attributes {stable_mosaic.version = 11 : i64} {
  func.func @kernel(%arg0: i32, %arg1: i32, %arg2: i32, %arg3: memref<1x128x8xf32, #tpu.memory_space<vmem>>, %arg4: memref<1x8x128xf32, #tpu.memory_space<vmem>>, %arg5: memref<1x2x128xf32, #tpu.memory_space<vmem>>, %arg6: memref<1x2x128xf32, #tpu.memory_space<vmem>>, %arg7: memref<128x128xf32, #tpu.memory_space<vmem>>, %arg8: memref<2x8x128xf32, #tpu.memory_space<vmem>>) attributes {dimension_semantics = [#tpu.dimension_semantics<parallel>, #tpu.dimension_semantics<arbitrary>, #tpu.dimension_semantics<arbitrary>], iteration_bounds = array<i64: 2, 2, 2>, scalar_prefetch = 0 : i64, scratch_operands = 2 : i64, tpu.core_type = #tpu.core_type<tc>, window_params = [{transform_indices = @transform_0, window_bounds = array<i64: 1, 128, 8>}, {transform_indices = @transform_1, window_bounds = array<i64: 1, 8, 128>}, {transform_indices = @transform_2, window_bounds = array<i64: 1, 2, 128>}, {transform_indices = @transform_3, window_bounds = array<i64: 1, 2, 128>}]} {
    %c0_i32 = arith.constant 0 : i32
    %0 = arith.cmpi eq, %arg2, %c0_i32 : i32
    %1 = arith.extui %0 : i1 to i32
    %c0_i32_0 = arith.constant 0 : i32
    %2 = arith.cmpi ne, %1, %c0_i32_0 : i32
    scf.if %2 {
      %cst_24 = arith.constant 0x7F800000 : f32
      %29 = vector.broadcast %cst_24 : f32 to vector<128x128xf32>
      %c0_25 = arith.constant 0 : index
      %c0_26 = arith.constant 0 : index
      %30 = vector.load %arg7[%c0_25, %c0_26] : memref<128x128xf32, #tpu.memory_space<vmem>>, vector<128x128xf32>
      tpu.vector_store %arg7[%c0_25, %c0_26], %29 {strides = array<i32>} : memref<128x128xf32, #tpu.memory_space<vmem>>, vector<128x128xf32>,
    } else {
    }
    %c0_i32_1 = arith.constant 0 : i32
    %3 = arith.cmpi eq, %arg1, %c0_i32_1 : i32
    %4 = arith.extui %3 : i1 to i32
    %c0_i32_2 = arith.constant 0 : i32
    %5 = arith.cmpi ne, %4, %c0_i32_2 : i32
    scf.if %5 {
      %cst_24 = arith.constant 0x7F800000 : f32
      %29 = vector.broadcast %cst_24 : f32 to vector<8x128xf32>
      %30 = arith.index_cast %arg2 : i32 to index
      %c0_25 = arith.constant 0 : index
      %c0_26 = arith.constant 0 : index
      %31 = vector.load %arg8[%30, %c0_25, %c0_26] : memref<2x8x128xf32, #tpu.memory_space<vmem>>, vector<1x8x128xf32>
      %32 = vector.shape_cast %31 : vector<1x8x128xf32> to vector<8x128xf32>
      %33 = vector.shape_cast %29 : vector<8x128xf32> to vector<1x8x128xf32>
      tpu.vector_store %arg8[%30, %c0_25, %c0_26], %33 {strides = array<i32>} : memref<2x8x128xf32, #tpu.memory_space<vmem>>, vector<1x8x128xf32>,
    } else {
    }
    %c0 = arith.constant 0 : index
    %c0_3 = arith.constant 0 : index
    %c0_4 = arith.constant 0 : index
    %6 = vector.load %arg3[%c0, %c0_3, %c0_4] : memref<1x128x8xf32, #tpu.memory_space<vmem>>, vector<1x128x8xf32>
    %7 = vector.shape_cast %6 : vector<1x128x8xf32> to vector<128x8xf32>
    %c0_5 = arith.constant 0 : index
    %c0_6 = arith.constant 0 : index
    %c0_7 = arith.constant 0 : index
    %8 = vector.load %arg4[%c0_5, %c0_6, %c0_7] : memref<1x8x128xf32, #tpu.memory_space<vmem>>, vector<1x8x128xf32>
    %9 = vector.shape_cast %8 : vector<1x8x128xf32> to vector<8x128xf32>
    %cst = arith.constant dense<0.000000e+00> : vector<128x128xf32>
    %10 = tpu.matmul %7, %9, %cst {dimension_numbers = #tpu.dot_dimension_numbers<[1], [0], [0], [1], [0, 0, 1, 1], [], []>, precision = #tpu.contract_precision<fp32>} : vector<128x8xf32>, vector<8x128xf32>, vector<128x128xf32> -> vector<128x128xf32>
    %c0_8 = arith.constant 0 : index
    %c0_9 = arith.constant 0 : index
    %11 = vector.load %arg7[%c0_8, %c0_9] : memref<128x128xf32, #tpu.memory_space<vmem>>, vector<128x128xf32>
    %12 = arith.minimumf %11, %10 : vector<128x128xf32>
    %c0_10 = arith.constant 0 : index
    %c0_11 = arith.constant 0 : index
    %13 = vector.load %arg7[%c0_10, %c0_11] : memref<128x128xf32, #tpu.memory_space<vmem>>, vector<128x128xf32>
    tpu.vector_store %arg7[%c0_10, %c0_11], %12 {strides = array<i32>} : memref<128x128xf32, #tpu.memory_space<vmem>>, vector<128x128xf32>,
    %14 = vector.shape_cast %10 : vector<128x128xf32> to vector<16x8x128xf32>
    %cst_12 = arith.constant dense<0x7F800000> : vector<8x128xf32>
    %15 = vector.multi_reduction <minimumf>, %14, %cst_12 [0] : vector<16x8x128xf32> to vector<8x128xf32>
    %c0_i32_13 = arith.constant 0 : i32
    %c0_i32_14 = arith.constant 0 : i32
    %16 = tpu.memref_slice %arg8[%arg2, %c0_i32_13, %c0_i32_14] : memref<2x8x128xf32, #tpu.memory_space<vmem>> -> memref<1x8x128xf32, #tpu.memory_space<vmem>>
    %17 = tpu.memref_squeeze %16 : memref<1x8x128xf32, #tpu.memory_space<vmem>> -> memref<8x128xf32, #tpu.memory_space<vmem>>
    %c0_15 = arith.constant 0 : index
    %c0_16 = arith.constant 0 : index
    %18 = vector.load %17[%c0_15, %c0_16] : memref<8x128xf32, #tpu.memory_space<vmem>>, vector<8x128xf32>
    %19 = arith.minimumf %18, %15 : vector<8x128xf32>
    %c0_i32_17 = arith.constant 0 : i32
    %c0_i32_18 = arith.constant 0 : i32
    %20 = tpu.memref_slice %arg8[%arg2, %c0_i32_17, %c0_i32_18] : memref<2x8x128xf32, #tpu.memory_space<vmem>> -> memref<1x8x128xf32, #tpu.memory_space<vmem>>
    %21 = tpu.memref_squeeze %20 : memref<1x8x128xf32, #tpu.memory_space<vmem>> -> memref<8x128xf32, #tpu.memory_space<vmem>>
    %c0_19 = arith.constant 0 : index
    %c0_20 = arith.constant 0 : index
    %22 = vector.load %21[%c0_19, %c0_20] : memref<8x128xf32, #tpu.memory_space<vmem>>, vector<8x128xf32>
    tpu.vector_store %21[%c0_19, %c0_20], %19 {strides = array<i32>} : memref<8x128xf32, #tpu.memory_space<vmem>>, vector<8x128xf32>,
    %c1_i32 = arith.constant 1 : i32
    %23 = arith.cmpi eq, %arg2, %c1_i32 : i32
    %24 = arith.extui %23 : i1 to i32
    %c0_i32_21 = arith.constant 0 : i32
    %25 = arith.cmpi ne, %24, %c0_i32_21 : i32
    scf.if %25 {
      %c0_24 = arith.constant 0 : index
      %c0_25 = arith.constant 0 : index
      %29 = vector.load %arg7[%c0_24, %c0_25] : memref<128x128xf32, #tpu.memory_space<vmem>>, vector<128x128xf32>
      %cst_26 = arith.constant dense<0x7F800000> : vector<128xf32>
      %30 = vector.multi_reduction <minimumf>, %29, %cst_26 [1] : vector<128x128xf32> to vector<128xf32>
      %cst_27 = arith.constant 0.000000e+00 : f32
      %31 = vector.broadcast %cst_27 : f32 to vector<128xf32>
      %32 = arith.maximumf %30, %31 : vector<128xf32>
      %33 = math.sqrt %32 : vector<128xf32>
      %c0_28 = arith.constant 0 : index
      %34 = arith.index_cast %arg1 : i32 to index
      %c0_29 = arith.constant 0 : index
      %35 = vector.load %arg5[%c0_28, %34, %c0_29] : memref<1x2x128xf32, #tpu.memory_space<vmem>>, vector<1x1x128xf32>
      %36 = vector.shape_cast %35 : vector<1x1x128xf32> to vector<128xf32>
      %37 = vector.shape_cast %33 : vector<128xf32> to vector<1x1x128xf32>
      tpu.vector_store %arg5[%c0_28, %34, %c0_29], %37 {strides = array<i32>} : memref<1x2x128xf32, #tpu.memory_space<vmem>>, vector<1x1x128xf32>,
    } else {
    }
    %c1_i32_22 = arith.constant 1 : i32
    %26 = arith.cmpi eq, %arg1, %c1_i32_22 : i32
    %27 = arith.extui %26 : i1 to i32
    %c0_i32_23 = arith.constant 0 : i32
    %28 = arith.cmpi ne, %27, %c0_i32_23 : i32
    scf.if %28 {
      %29 = arith.index_cast %arg2 : i32 to index
      %c0_24 = arith.constant 0 : index
      %c0_25 = arith.constant 0 : index
      %30 = vector.load %arg8[%29, %c0_24, %c0_25] : memref<2x8x128xf32, #tpu.memory_space<vmem>>, vector<1x8x128xf32>
      %31 = vector.shape_cast %30 : vector<1x8x128xf32> to vector<8x128xf32>
      %cst_26 = arith.constant dense<0x7F800000> : vector<128xf32>
      %32 = vector.multi_reduction <minimumf>, %31, %cst_26 [0] : vector<8x128xf32> to vector<128xf32>
      %cst_27 = arith.constant 0.000000e+00 : f32
      %33 = vector.broadcast %cst_27 : f32 to vector<128xf32>
      %34 = arith.maximumf %32, %33 : vector<128xf32>
      %35 = math.sqrt %34 : vector<128xf32>
      %c0_28 = arith.constant 0 : index
      %36 = arith.index_cast %arg2 : i32 to index
      %c0_29 = arith.constant 0 : index
      %37 = vector.load %arg6[%c0_28, %36, %c0_29] : memref<1x2x128xf32, #tpu.memory_space<vmem>>, vector<1x1x128xf32>
      %38 = vector.shape_cast %37 : vector<1x1x128xf32> to vector<128xf32>
      %39 = vector.shape_cast %35 : vector<128xf32> to vector<1x1x128xf32>
      tpu.vector_store %arg6[%c0_28, %36, %c0_29], %39 {strides = array<i32>} : memref<1x2x128xf32, #tpu.memory_space<vmem>>, vector<1x1x128xf32>,
    } else {
    }
    return
  }
  func.func @transform_0(%arg0: i32, %arg1: i32, %arg2: i32) -> (i32, i32, i32) {
    %c0_i32 = arith.constant 0 : i32
    %c0_i32_0 = arith.constant 0 : i32
    return %arg0, %arg1, %c0_i32 : i32, i32, i32
  }
  func.func @transform_1(%arg0: i32, %arg1: i32, %arg2: i32) -> (i32, i32, i32) {
    %c0_i32 = arith.constant 0 : i32
    %c0_i32_0 = arith.constant 0 : i32
    return %arg0, %c0_i32, %arg2 : i32, i32, i32
  }
  func.func @transform_2(%arg0: i32, %arg1: i32, %arg2: i32) -> (i32, i32, i32) {
    %c0_i32 = arith.constant 0 : i32
    %c0_i32_0 = arith.constant 0 : i32
    %c0_i32_1 = arith.constant 0 : i32
    return %arg0, %c0_i32, %c0_i32_0 : i32, i32, i32
  }
  func.func @transform_3(%arg0: i32, %arg1: i32, %arg2: i32) -> (i32, i32, i32) {
    %c0_i32 = arith.constant 0 : i32
    %c0_i32_0 = arith.constant 0 : i32
    %c0_i32_1 = arith.constant 0 : i32
    return %arg0, %c0_i32, %c0_i32_0 : i32, i32, i32
  }
}

</mosaic_0001>

<bundles_post_ra>
// kernel: _lambda_.1
= control target key start
LH: loop header
LB: loop body
LE: loop exit
PB: predicated region body
PF: predicated region fallthrough
CT: control target
= control target key end

     0   :  { %s2408_s12 = smov 0   ;;  %s2410_s13 = smov 0   ;;  %s3222_s0 = inlined_call_operand.vmem [shape: f32[2,256,8], index: 0, kind: input, shape index: {}]   ;;  %s3223_s1 = inlined_call_operand.vmem [shape: f32[2,8,256], index: 1, kind: input, shape index: {}]   ;;  %s3224_s2 = inlined_call_operand.vmem [shape: f32[2,2,128], index: 2, kind: output, shape index: {0}]   ;;  %s3225_s3 = inlined_call_operand.vmem [shape: f32[2,2,128], index: 3, kind: output, shape index: {1}]  }
   0x1   :  { %s2412_s14 = smov 0   ;;  %s2414_s15 = smov 0  }
   0x2   :  { %s2416_s16 = smov 0   ;;  %s2418_s17 = smov 0  }
   0x3   :  { %s2420_s18 = smov 0  }
   0x4 LB: > { %s26_s19 = sadd.s32 1, %s2372_s15  ;;  %s29_s20 = sadd.s32 1, %s2376_s16  ;;  %s2384_s18 = sphi %s2420_s18, %s14_s18   ;;  %s2380_s17 = sphi %s2418_s17, %s3253_s17   ;;  %s2376_s16 = sphi %s2416_s16, %s3252_s16   ;;  %s2372_s15 = sphi %s2414_s15, %s3251_s15   ;;  %s2368_s14 = sphi %s2412_s14, %s3250_s14   ;;  %s2364_s13 = sphi %s2410_s13, %s3249_s13   ;;  %s2360_s12 = sphi %s2408_s12, %s3248_s12  }
   0x5   : > { %p27_p0 = scmp.ge.s32.totalorder %s26_s19, 2  ;;  %p1964_p1 = scmp.ge.s32.totalorder %s2384_s18, 1 }
   0x6   : > { %p181_p2 = scmp.lt.s32.totalorder %s2384_s18, 9  ;;  %s33_s21 = sadd.s32 1, %s2380_s17 }
   0x7   : > { %s3255_s19 = smov (%p27_p0, %s26_s19), 0  ;;  %s3257_s20 = smov (!%p27_p0, %s29_s20), %s2376_s16 }
   0x8   : > { %p182_p3 = pnand %p1964_p1, %p181_p2  ;;  %p31_p4 = scmp.ge.s32.totalorder %s3257_s20, 2 }
   0xa   : > { %s3259_s20 = smov (%p31_p4, %s3257_s20), 0  ;;  %s3261_s21 = smov (!%p31_p4, %s33_s21), %s2380_s17 }
   0xb   : > { %p35_p5 = scmp.ge.s32.totalorder %s3261_s21, 2  ;;  %185 = sbr.rel (%p182_p3) target bundleno = 598 (0x256), region = 28 }
   0xd   : > { %s3263_s21 = smov (%p35_p5, %s3261_s21), 0 }
  0x10   : > { %s1965_s22 = sshll.u32 %s2364_s13, 4  ;;  %p221_p6 = scmp.lt.s32.totalorder %s2368_s14, 1 }
  0x11   : > { %p223_p7 = scmp.lt.s32.totalorder %s1965_s22, 31  ;;  %p232_p8 = scmp.lt.s32.totalorder %s2360_s12, 1 }
  0x12   : > { %s3265_s14 = smov (!%p221_p6, %s2368_s14), 1  ;;  %p1972_p9 = scmp.ne.s32.totalorder %s2360_s12, 0 }
  0x13   : > { %s3267_s22 = smov (!%p223_p7, %s1965_s22), 31  ;;  %s1966_s23 = sshll.u32 %s3265_s14, 5 }
  0x14   : > { %s2456_s24 = sshll.u32 %s3265_s14, 1  ;;  %s226_s25 = sadd.s32 %s1966_s23, %s3267_s22 }
  0x15   : > { %s241_s28 = scalar_lea.vmem %s3224_s2, %s2456_s24  ;;  %s1967_s29 = sshll.u32 %s226_s25, 3 }
  0x16   : > { %s245_s5 = scalar_lea.vmem %s3225_s3, %s2456_s24  ;;  %s2469_s8 = scalar_lea.vmem %s3222_s0, %s1967_s29 }
  0x17   : > { %s233_s9 = scalar_select %p232_p8, %s2360_s12, 1 }
  0x18   : > { %249 = sbr.rel (%p1972_p9) target bundleno = 38 (0x26), region = 32 }
  0x19   : > { %s235_s10 = sadd.s32 %s2456_s24, %s233_s9 }
  0x1a   : > { %s2473_s11 = sshll.u32 %s235_s10, 3 }
  0x1b   : > { %s237_s23 = scalar_lea.vmem %s3223_s1, %s2473_s11 }
  0x1d   : > { %v2386_v0 = vmov inf  }
  0x1e   : > { %250 = vst [vmem:[#allocation2 + $0x30] sm:$0xff] %v2386_v0  ;;  %251 = vst [vmem:[#allocation2] sm:$0xff] %v2386_v0 }
  0x1f   : > { %252 = vst [vmem:[#allocation2 + $0x58] sm:$0xff] %v2386_v0  ;;  %253 = vst [vmem:[#allocation2 + $0x18] sm:$0xff] %v2386_v0 }
  0x20   : > { %254 = vst [vmem:[#allocation2 + $0x50] sm:$0xff] %v2386_v0  ;;  %255 = vst [vmem:[#allocation2 + $0x68] sm:$0xff] %v2386_v0 }
  0x21   : > { %256 = vst [vmem:[#allocation2 + $0x8] sm:$0xff] %v2386_v0  ;;  %257 = vst [vmem:[#allocation2 + $0x48] sm:$0xff] %v2386_v0 }
  0x22   : > { %258 = vst [vmem:[#allocation2 + $0x40] sm:$0xff] %v2386_v0  ;;  %259 = vst [vmem:[#allocation2 + $0x20] sm:$0xff] %v2386_v0 }
  0x23   : > { %260 = vst [vmem:[#allocation2 + $0x10] sm:$0xff] %v2386_v0  ;;  %261 = vst [vmem:[#allocation2 + $0x38] sm:$0xff] %v2386_v0 }
  0x24   : > { %262 = vst [vmem:[#allocation2 + $0x60] sm:$0xff] %v2386_v0  ;;  %263 = vst [vmem:[#allocation2 + $0x70] sm:$0xff] %v2386_v0 }
  0x25   : > { %264 = vst [vmem:[#allocation2 + $0x78] sm:$0xff] %v2386_v0  ;;  %265 = vst [vmem:[#allocation2 + $0x28] sm:$0xff] %v2386_v0 }
  0x26 PF: > { %p1973_p10 = scmp.ne.s32.totalorder %s2364_s13, 0 }
  0x27   : > { %s1974_s25 = sshll.u32 (!%p1973_p10), %s2360_s12, 3 }
  0x28   : > { %269 = sbr.rel (%p1973_p10) target bundleno = 47 (0x2f), region = 36  ;;  %s271_s26 = scalar_lea.vmem (!%p1973_p10), [#allocation3], %s1974_s25 }
  0x2d   : > { %v2387_v1 = vmov inf  }
  0x2e   : > { %272 = vst [vmem:[%s271_s26] sm:$0xff] %v2387_v1 }
  0x2f PF: > { %v289_v2 = vld [vmem:[%s237_s23] sm:$0xff]  ;;  %vm290_vm0 = vcmask 64512   ;;  %v274_v4 = vld [vmem:[%s2469_s8 + $0x8] sm:$0xff]  ;;  %v275_v8 = vld [vmem:[%s2469_s8 + $0x10] sm:$0xff]  ;;  %s1975_s27 = sshll.u32 %s2360_s12, 3  ;;  %p1976_p11 = scmp.ne.s32.totalorder %s2360_s12, 1 }
  0x30   : > { %v273_v3 = vld [vmem:[%s2469_s8] sm:$0xff]  ;;  %v2484_v5 = vand.u32 4294901760, %v289_v2  ;;  %v295_v7 = vsel %vm290_vm0, %v274_v4, 0  ;;  %v276_v9 = vld [vmem:[%s2469_s8 + $0x18] sm:$0xff]  ;;  %v298_v13 = vsel %vm290_vm0, %v275_v8, 0  ;;  %v278_v15 = vld [vmem:[%s2469_s8 + $0x28] sm:$0xff]  ;;  %s1806_s6 = scalar_lea.vmem (!%p1976_p11), %s241_s28, %s2364_s13 }
  0x31   : > { %v292_v6 = vsel %vm290_vm0, %v273_v3, 0  ;;  %v277_v10 = vld [vmem:[%s2469_s8 + $0x20] sm:$0xff]  ;;  %v2493_v12 = vand.u32 4294901760, %v295_v7  ;;  %v301_v14 = vsel %vm290_vm0, %v276_v9, 0  ;;  %v2500_v17 = vand.u32 4294901760, %v298_v13  ;;  %v279_v20 = vld [vmem:[%s2469_s8 + $0x30] sm:$0xff] }
  0x32   : > { %v2491_v11 = vand.u32 4294901760, %v292_v6  ;;  %2082 = vmatprep.subr.mxu0 %v2484_v5  ;;  %v597_v16 = vsub.f32 %v289_v2, %v2484_v5  ;;  %v2502_v18 = vand.u32 4294901760, %v301_v14  ;;  %v304_v19 = vsel %vm290_vm0, %v277_v10, 0  ;;  %v280_v41 = vld [vmem:[%s2469_s8 + $0x38] sm:$0xff]  ;;  %v281_v46 = vld [vmem:[%s2469_s8 + $0x40] sm:$0xff]  ;;  %v282_v51 = vld [vmem:[%s2469_s8 + $0x48] sm:$0xff] }
  0x33   : > { %2083 = vmatpush3.msra.mxu0 %v2484_v5  ;;  %v2512_v22 = vsub.f32 %v295_v7, %v2493_v12  ;;  %v2514_v23 = vand.u32 4294901760, %v304_v19  ;;  %v307_v24 = vsel %vm290_vm0, %v278_v15, 0  ;;  %v2520_v26 = vsub.f32 %v298_v13, %v2500_v17  ;;  %v283_v52 = vld [vmem:[%s2469_s8 + $0x50] sm:$0xff]  ;;  %v284_v57 = vld [vmem:[%s2469_s8 + $0x58] sm:$0xff]  ;;  %v285_v62 = vld [vmem:[%s2469_s8 + $0x60] sm:$0xff]  ;;  %s2913_s29 = scalar_lea.vmem [#allocation3], %s1975_s27 }
  0x34   : > { %v2508_v21 = vsub.f32 %v292_v6, %v2491_v11  ;;  %2110 = vmatprep.mubr.f32.mxu1 %v2491_v11  ;;  %v2517_v25 = vand.u32 4294901760, %v597_v16  ;;  %2134 = vmatprep.subr.mxu0 %v597_v16  ;;  %v2523_v27 = vsub.f32 %v301_v14, %v2502_v18  ;;  %v2525_v28 = vand.u32 4294901760, %v307_v24  ;;  %v286_v63 = vld [vmem:[%s2469_s8 + $0x68] sm:$0xff]  ;;  %v287_v15 = vld [vmem:[%s2469_s8 + $0x70] sm:$0xff] }
  0x35   : > { %v417_v30 = vand.u32 4294901760, %v2512_v22  ;;  %v2530_v31 = vsub.f32 %v304_v19, %v2514_v23  ;;  %v310_v32 = vsel %vm290_vm0, %v279_v20, 0  ;;  %v427_v34 = vand.u32 4294901760, %v2520_v26 }
  0x36   : > { %v407_v29 = vand.u32 4294901760, %v2508_v21  ;;  %v599_v33 = vsub.f32 %v597_v16, %v2517_v25  ;;  %v437_v35 = vand.u32 4294901760, %v2523_v27  ;;  %v2537_v36 = vsub.f32 %v307_v24, %v2525_v28 }
  0x37   : > { %v418_v38 = vsub.f32 %v2512_v22, %v417_v30  ;;  %v447_v39 = vand.u32 4294901760, %v2530_v31  ;;  %v2546_v40 = vand.u32 4294901760, %v310_v32  ;;  %v428_v43 = vsub.f32 %v2520_v26, %v427_v34 }
  0x38   : > { %v408_v37 = vsub.f32 %v2508_v21, %v407_v29  ;;  %v600_v42 = vand.u32 4294901760, %v599_v33  ;;  %v438_v44 = vsub.f32 %v2523_v27, %v437_v35  ;;  %v457_v45 = vand.u32 4294901760, %v2537_v36 }
  0x39   : > { %v419_v48 = vand.u32 4294901760, %v418_v38  ;;  %v448_v49 = vsub.f32 %v2530_v31, %v447_v39  ;;  %v2561_v50 = vsub.f32 %v310_v32, %v2546_v40  ;;  %v429_v53 = vand.u32 4294901760, %v428_v43 }
  0x3a   : > { %v409_v47 = vand.u32 4294901760, %v408_v37  ;;  %2108 = vmatprep.subr.mxu1 %v600_v42  ;;  %v439_v54 = vand.u32 4294901760, %v438_v44  ;;  %v458_v55 = vsub.f32 %v2537_v36, %v457_v45  ;;  %v313_v56 = vsel %vm290_vm0, %v280_v41, 0 }
  0x3b   : > { %2109 = vmatpush3.msra.mxu1 %v600_v42  ;;  %v449_v58 = vand.u32 4294901760, %v448_v49  ;;  %v467_v59 = vand.u32 4294901760, %v2561_v50  ;;  %v2571_v60 = vand.u32 4294901760, %v313_v56  ;;  %v316_v61 = vsel %vm290_vm0, %v281_v46, 0  ;;  %v288_v49 = vld [vmem:[%s2469_s8 + $0x78] sm:$0xff] }
  0x3c   : > { %2084 = vmatprep.mubr.f32.mxu0 %v409_v47  ;;  %2111 = vmatmul.mubr.f32.vlgmr.msra.gmra.mxu1 %v2493_v12  ;;  %v459_v0 = vand.u32 4294901760, %v458_v55  ;;  %v2577_v1 = vand.u32 4294901760, %v316_v61  ;;  %v319_v2 = vsel %vm290_vm0, %v282_v51, 0  ;;  %v322_v3 = vsel %vm290_vm0, %v283_v52, 0 }
  0x3d   : > { %2085 = vmatmul.mubr.f32.vlgmr.msra.gmra.mxu0 %v419_v48  ;;  %2160 = vmatprep.subr.mxu1 %v2484_v5  ;;  %v468_v4 = vsub.f32 %v2561_v50, %v467_v59  ;;  %v2586_v6 = vsub.f32 %v313_v56, %v2571_v60  ;;  %v2588_v7 = vand.u32 4294901760, %v319_v2  ;;  %v2590_v8 = vand.u32 4294901760, %v322_v3 }
  0x3e   : > { %2135 = vmatpush3.msra.mxu0 %v597_v16  ;;  %2161 = vmatpush3.msra.mxu1 %v2484_v5  ;;  %v2594_v9 = vsub.f32 %v316_v61, %v2577_v1  ;;  %v325_v10 = vsel %vm290_vm0, %v284_v57, 0  ;;  %v328_v13 = vsel %vm290_vm0, %v285_v62, 0  ;;  %v331_v14 = vsel %vm290_vm0, %v286_v63, 0 }
  0x3f   : > { %2087 = vmatprep.mubr.f32.mxu0 %v429_v53  ;;  %2113 = vmatprep.mubr.f32.mxu1 %v2500_v17  ;;  %v469_v16 = vand.u32 4294901760, %v468_v4  ;;  %v477_v19 = vand.u32 4294901760, %v2586_v6  ;;  %v2603_v20 = vsub.f32 %v319_v2, %v2588_v7  ;;  %v2606_v24 = vsub.f32 %v322_v3, %v2590_v8 }
  0x40   : > { %2186 = vmatprep.subr.mxu0 %v2517_v25  ;;  %2114 = vmatmul.mubr.f32.gmra.mxu1 %v2502_v18  ;;  %v487_v32 = vand.u32 4294901760, %v2594_v9  ;;  %v2611_v33 = vand.u32 4294901760, %v325_v10  ;;  %v2613_v37 = vand.u32 4294901760, %v328_v13  ;;  %v2615_v38 = vand.u32 4294901760, %v331_v14 }
  0x41   : > { %2088 = vmatmul.mubr.f32.gmra.mxu0 %v439_v54  ;;  %2116 = vmatprep.mubr.f32.mxu1 %v2514_v23  ;;  %v478_v41 = vsub.f32 %v2586_v6, %v477_v19  ;;  %v497_v42 = vand.u32 4294901760, %v2603_v20  ;;  %v507_v43 = vand.u32 4294901760, %v2606_v24  ;;  %v334_v44 = vsel %vm290_vm0, %v287_v15, 0 }
  0x42   : > { %2090 = vmatprep.mubr.f32.mxu0 %v449_v58  ;;  %v488_v46 = vsub.f32 %v2594_v9, %v487_v32  ;;  %v2628_v47 = vsub.f32 %v325_v10, %v2611_v33  ;;  %v2631_v48 = vsub.f32 %v328_v13, %v2613_v37  ;;  %2212 = vmatprep.subr.mxu1 %v2484_v5  ;;  %v2638_v52 = vand.u32 4294901760, %v334_v44 }
  0x43   : > { %v2636_v51 = vsub.f32 %v331_v14, %v2615_v38  ;;  %v479_v53 = vand.u32 4294901760, %v478_v41  ;;  %v498_v54 = vsub.f32 %v2603_v20, %v497_v42  ;;  %v508_v55 = vsub.f32 %v2606_v24, %v507_v43 }
  0x44   : > { %2117 = vmatmul.mubr.f32.gmra.mxu1 %v2525_v28  ;;  %v517_v56 = vand.u32 4294901760, %v2628_v47  ;;  %v489_v57 = vand.u32 4294901760, %v488_v46  ;;  %v527_v58 = vand.u32 4294901760, %v2631_v48  ;;  %v2651_v61 = vsub.f32 %v334_v44, %v2638_v52 }
  0x45   : > { %2091 = vmatmul.mubr.f32.gmra.mxu0 %v459_v0  ;;  %2119 = vmatprep.mubr.f32.mxu1 %v2546_v40  ;;  %v337_v62 = vsel %vm290_vm0, %v288_v49, 0  ;;  %v499_v0 = vand.u32 4294901760, %v498_v54  ;;  %v537_v3 = vand.u32 4294901760, %v2636_v51  ;;  %v509_v10 = vand.u32 4294901760, %v508_v55 }
  0x46   : > { %2093 = vmatprep.mubr.f32.mxu0 %v469_v16  ;;  %v2654_v63 = vand.u32 4294901760, %v337_v62  ;;  %v518_v2 = vsub.f32 %v2628_v47, %v517_v56  ;;  %v528_v13 = vsub.f32 %v2631_v48, %v527_v58  ;;  %v547_v14 = vand.u32 4294901760, %v2651_v61 }
  0x47   : > { %v538_v16 = vsub.f32 %v2636_v51, %v537_v3 }
  0x48   : > { %2120 = vmatmul.mubr.f32.gmra.mxu1 %v2571_v60  ;;  %v556_v4 = vsub.f32 %v337_v62, %v2654_v63  ;;  %v519_v15 = vand.u32 4294901760, %v518_v2  ;;  %v529_v44 = vand.u32 4294901760, %v528_v13  ;;  %v548_v46 = vsub.f32 %v2651_v61, %v547_v14 }
  0x49   : > { %2094 = vmatmul.mubr.f32.gmra.mxu0 %v479_v53  ;;  %2122 = vmatprep.mubr.f32.mxu1 %v2577_v1  ;;  %v539_v49 = vand.u32 4294901760, %v538_v16 }
  0x4a   : > { %2096 = vmatprep.mubr.f32.mxu0 %v489_v57  ;;  %v557_v41 = vand.u32 4294901760, %v556_v4  ;;  %v549_v54 = vand.u32 4294901760, %v548_v46 }
  0x4c   : > { %2123 = vmatmul.mubr.f32.gmra.mxu1 %v2588_v7  ;;  %v558_v53 = vsub.f32 %v556_v4, %v557_v41 }
  0x4d   : > { %2097 = vmatmul.mubr.f32.gmra.mxu0 %v499_v0  ;;  %2125 = vmatprep.mubr.f32.mxu1 %v2590_v8 }
  0x4e   : > { %2099 = vmatprep.mubr.f32.mxu0 %v509_v10  ;;  %v559_v55 = vand.u32 4294901760, %v558_v53 }
  0x50   : > { %2126 = vmatmul.mubr.f32.gmra.mxu1 %v2611_v33 }
  0x51   : > { %2100 = vmatmul.mubr.f32.gmra.mxu0 %v519_v15  ;;  %2128 = vmatprep.mubr.f32.mxu1 %v2613_v37 }
  0x52   : > { %2102 = vmatprep.mubr.f32.mxu0 %v529_v44 }
  0x54   : > { %2129 = vmatmul.mubr.f32.gmra.mxu1 %v2615_v38 }
  0x55   : > { %2103 = vmatmul.mubr.f32.gmra.mxu0 %v539_v49  ;;  %2131 = vmatprep.mubr.f32.mxu1 %v2638_v52 }
  0x56   : > { %2105 = vmatprep.mubr.f32.mxu0 %v549_v54 }
  0x58   : > { %2132 = vmatmul.mubr.f32.gmra.mxu1 %v2654_v63 }
  0x59   : > { %2106 = vmatmul.mubr.f32.gmra.mxu0 %v559_v55  ;;  %2162 = vmatprep.mubr.f32.mxu1 %v407_v29 }
  0x5a   : > { %2136 = vmatprep.mubr.f32.mxu0 %v2508_v21 }
  0x5c   : > { %2163 = vmatmul.mubr.f32.vlgmr.msra.gmra.mxu1 %v417_v30 }
  0x5d   : > { %2137 = vmatmul.mubr.f32.vlgmr.msra.gmra.mxu0 %v2512_v22  ;;  %2213 = vmatpush3.msra.mxu1 %v2484_v5 }
  0x5e   : > { %2187 = vmatpush3.msra.mxu0 %v2517_v25  ;;  %2139 = vmatprep.mubr.f32.mxu0 %v2520_v26 }
  0x5f   : > { %2165 = vmatprep.mubr.f32.mxu1 %v427_v34 }
  0x60   : > { %2166 = vmatmul.mubr.f32.gmra.mxu1 %v437_v35 }
  0x61   : > { %2140 = vmatmul.mubr.f32.gmra.mxu0 %v2523_v27  ;;  %2168 = vmatprep.mubr.f32.mxu1 %v447_v39 }
  0x62   : > { %2142 = vmatprep.mubr.f32.mxu0 %v2530_v31 }
  0x64   : > { %2169 = vmatmul.mubr.f32.gmra.mxu1 %v457_v45 }
  0x65   : > { %2143 = vmatmul.mubr.f32.gmra.mxu0 %v2537_v36  ;;  %2171 = vmatprep.mubr.f32.mxu1 %v467_v59 }
  0x66   : > { %2145 = vmatprep.mubr.f32.mxu0 %v2561_v50 }
  0x68   : > { %2172 = vmatmul.mubr.f32.gmra.mxu1 %v477_v19 }
  0x69   : > { %2146 = vmatmul.mubr.f32.gmra.mxu0 %v2586_v6  ;;  %2174 = vmatprep.mubr.f32.mxu1 %v487_v32 }
  0x6a   : > { %2148 = vmatprep.mubr.f32.mxu0 %v2594_v9 }
  0x6c   : > { %2175 = vmatmul.mubr.f32.gmra.mxu1 %v497_v42 }
  0x6d   : > { %2149 = vmatmul.mubr.f32.gmra.mxu0 %v2603_v20  ;;  %2177 = vmatprep.mubr.f32.mxu1 %v507_v43 }
  0x6e   : > { %2151 = vmatprep.mubr.f32.mxu0 %v2606_v24 }
  0x70   : > { %2178 = vmatmul.mubr.f32.gmra.mxu1 %v517_v56 }
  0x71   : > { %2152 = vmatmul.mubr.f32.gmra.mxu0 %v2628_v47  ;;  %2180 = vmatprep.mubr.f32.mxu1 %v527_v58 }
  0x72   : > { %2154 = vmatprep.mubr.f32.mxu0 %v2631_v48 }
  0x74   : > { %2181 = vmatmul.mubr.f32.gmra.mxu1 %v537_v3 }
  0x75   : > { %2155 = vmatmul.mubr.f32.gmra.mxu0 %v2636_v51  ;;  %2183 = vmatprep.mubr.f32.mxu1 %v547_v14 }
  0x76   : > { %2157 = vmatprep.mubr.f32.mxu0 %v2651_v61 }
  0x78   : > { %2184 = vmatmul.mubr.f32.gmra.mxu1 %v557_v41 }
  0x79   : > { %2158 = vmatmul.mubr.f32.gmra.mxu0 %v556_v4  ;;  %2214 = vmatprep.mubr.f32.mxu1 %v2491_v11 }
  0x7a   : > { %2188 = vmatprep.mubr.f32.mxu0 %v2491_v11 }
  0x7c   : > { %2215 = vmatmul.mubr.f32.vlgmr.msra.gmra.mxu1 %v2493_v12 }
  0x7d   : > { %2189 = vmatmul.mubr.f32.vlgmr.msra.gmra.mxu0 %v2493_v12  ;;  %2217 = vmatprep.mubr.f32.mxu1 %v2500_v17 }
  0x7e   : > { %2191 = vmatprep.mubr.f32.mxu0 %v2500_v17 }
  0x80   : > { %2218 = vmatmul.mubr.f32.gmra.mxu1 %v2502_v18 }
  0x81   : > { %2192 = vmatmul.mubr.f32.gmra.mxu0 %v2502_v18  ;;  %2220 = vmatprep.mubr.f32.mxu1 %v2514_v23 }
  0x82   : > { %2194 = vmatprep.mubr.f32.mxu0 %v2514_v23 }
  0x84   : > { %2221 = vmatmul.mubr.f32.gmra.mxu1 %v2525_v28 }
  0x85   : > { %2195 = vmatmul.mubr.f32.gmra.mxu0 %v2525_v28  ;;  %2223 = vmatprep.mubr.f32.mxu1 %v2546_v40 }
  0x86   : > { %2197 = vmatprep.mubr.f32.mxu0 %v2546_v40 }
  0x88   : > { %2224 = vmatmul.mubr.f32.gmra.mxu1 %v2571_v60 }
  0x89   : > { %2198 = vmatmul.mubr.f32.gmra.mxu0 %v2571_v60  ;;  %2226 = vmatprep.mubr.f32.mxu1 %v2577_v1 }
  0x8a   : > { %2200 = vmatprep.mubr.f32.mxu0 %v2577_v1 }
  0x8c   : > { %2227 = vmatmul.mubr.f32.gmra.mxu1 %v2588_v7 }
  0x8d   : > { %2201 = vmatmul.mubr.f32.gmra.mxu0 %v2588_v7  ;;  %2229 = vmatprep.mubr.f32.mxu1 %v2590_v8 }
  0x8e   : > { %2203 = vmatprep.mubr.f32.mxu0 %v2590_v8 }
  0x90   : > { %2230 = vmatmul.mubr.f32.gmra.mxu1 %v2611_v33 }
  0x91   : > { %2204 = vmatmul.mubr.f32.gmra.mxu0 %v2611_v33  ;;  %2232 = vmatprep.mubr.f32.mxu1 %v2613_v37 }
  0x92   : > { %2206 = vmatprep.mubr.f32.mxu0 %v2613_v37 }
  0x94   : > { %2233 = vmatmul.mubr.f32.gmra.mxu1 %v2615_v38 }
  0x95   : > { %2207 = vmatmul.mubr.f32.gmra.mxu0 %v2615_v38  ;;  %2235 = vmatprep.mubr.f32.mxu1 %v2638_v52 }
  0x96   : > { %2209 = vmatprep.mubr.f32.mxu0 %v2638_v52 }
  0x98   : > { %2236 = vmatmul.mubr.f32.gmra.mxu1 %v2654_v63 }
  0x99   : > { %2210 = vmatmul.mubr.f32.gmra.mxu0 %v2654_v63 }
  0xfc   : > { %v2112_v11 = vpop.f32.mrf.mxu1 }
  0xfd   : > { %v2086_v5 = vpop.f32.mrf.mxu0 }
  0xfe   : > { %v637_v17 = vpop.f32.mrf.mxu1  ;;  %v644_v44 = vadd.f32 %v2112_v11, %v2086_v5 }
  0xff   : > { %v411_v12 = vpop.f32.mrf.mxu0 }
 0x100   : > { %v2115_v21 = vpop.f32.mrf.mxu1  ;;  %v638_v53 = vadd.f32 %v637_v17, %v411_v12 }
 0x101   : > { %v2089_v18 = vpop.f32.mrf.mxu0 }
 0x102   : > { %v649_v23 = vpop.f32.mrf.mxu1 }
 0x103   : > { %v431_v22 = vpop.f32.mrf.mxu0 }
 0x104   : > { %v2753_v26 = vpop.f32.mrf.mxu1 }
 0x105   : > { %v2751_v25 = vpop.f32.mrf.mxu0 }
 0x106   : > { %v2757_v28 = vpop.f32.mrf.mxu1  ;;  %v668_v5 = vadd.f32 %v2753_v26, %v2751_v25  ;;  %v1430_v26 = vld [vmem:[#allocation2 + $0x30] sm:$0xff] }
 0x107   : > { %v2755_v27 = vpop.f32.mrf.mxu0 }
 0x108   : > { %v2761_v30 = vpop.f32.mrf.mxu1 }
 0x109   : > { %v2759_v29 = vpop.f32.mrf.mxu0 }
 0x10a   : > { %v2765_v34 = vpop.f32.mrf.mxu1 }
 0x10b   : > { %v2763_v31 = vpop.f32.mrf.mxu0 }
 0x10c   : > { %v2769_v36 = vpop.f32.mrf.mxu1 }
 0x10d   : > { %v2767_v35 = vpop.f32.mrf.mxu0 }
 0x10e   : > { %v2773_v40 = vpop.f32.mrf.mxu1 }
 0x10f   : > { %v2771_v39 = vpop.f32.mrf.mxu0 }
 0x110   : > { %v2777_v50 = vpop.f32.mrf.mxu1 }
 0x111   : > { %v2775_v45 = vpop.f32.mrf.mxu0 }
 0x112   : > { %v2781_v60 = vpop.f32.mrf.mxu1 }
 0x113   : > { %v2779_v59 = vpop.f32.mrf.mxu0 }
 0x114   : > { %v2785_v6 = vpop.f32.mrf.mxu1 }
 0x115   : > { %v2783_v1 = vpop.f32.mrf.mxu0 }
 0x116   : > { %v2789_v8 = vpop.f32.mrf.mxu1 }
 0x117   : > { %v2787_v7 = vpop.f32.mrf.mxu0 }
 0x118   : > { %v2793_v19 = vpop.f32.mrf.mxu1 }
 0x119   : > { %v2791_v9 = vpop.f32.mrf.mxu0  ;;  %3227 = vst [vmem:[#allocation5_spill] sm:$0xff] %v2793_v19 }
 0x11a   : > { %3226 = vst [vmem:[#allocation4_spill] sm:$0xff] %v2791_v9  ;;  %v2797_v24 = vpop.f32.mrf.mxu1  ;;  %v650_v9 = vadd.f32 %v649_v23, %v431_v22 }
 0x11b   : > { %v2795_v20 = vpop.f32.mrf.mxu0  ;;  %3229 = vst [vmem:[#allocation7_spill] sm:$0xff] %v2797_v24 }
 0x11c   : > { %3228 = vst [vmem:[#allocation6_spill] sm:$0xff] %v2795_v20  ;;  %v2164_v33 = vpop.f32.mrf.mxu1  ;;  %v656_v20 = vadd.f32 %v2115_v21, %v2089_v18  ;;  %v662_v21 = vadd.f32 %v2757_v28, %v2755_v27  ;;  %v674_v27 = vadd.f32 %v2765_v34, %v2763_v31 }
 0x11d   : > { %v2138_v32 = vpop.f32.mrf.mxu0 }
 0x11e   : > { %v980_v38 = vpop.f32.mrf.mxu1  ;;  %v809_v54 = vadd.f32 %v2138_v32, %v644_v44 }
 0x11f   : > { %v801_v37 = vpop.f32.mrf.mxu0 }
 0x120   : > { %v2167_v43 = vpop.f32.mrf.mxu1  ;;  %v802_v19 = vadd.f32 %v801_v37, %v638_v53 }
 0x121   : > { %v2141_v42 = vpop.f32.mrf.mxu0 }
 0x122   : > { %v996_v48 = vpop.f32.mrf.mxu1  ;;  %v981_v17 = vadd.f32 %v980_v38, %v802_v19 }
 0x123   : > { %v815_v47 = vpop.f32.mrf.mxu0 }
 0x124   : > { %v2170_v52 = vpop.f32.mrf.mxu1  ;;  %v816_v11 = vadd.f32 %v815_v47, %v650_v9 }
 0x125   : > { %v2144_v51 = vpop.f32.mrf.mxu0 }
 0x126   : > { %v2799_v57 = vpop.f32.mrf.mxu1  ;;  %v837_v44 = vadd.f32 %v2144_v51, %v668_v5  ;;  %v997_v25 = vadd.f32 %v996_v48, %v816_v11  ;;  %v1435_v11 = vld [vmem:[#allocation2 + $0x68] sm:$0xff] }
 0x127   : > { %v829_v56 = vpop.f32.mrf.mxu0 }
 0x128   : > { %v2801_v61 = vpop.f32.mrf.mxu1  ;;  %v830_v19 = vadd.f32 %v829_v56, %v662_v21  ;;  %v1021_v28 = vadd.f32 %v2170_v52, %v837_v44  ;;  %v692_v56 = vadd.f32 %v2769_v36, %v2767_v35 }
 0x129   : > { %v2147_v58 = vpop.f32.mrf.mxu0 }
 0x12a   : > { %v2803_v63 = vpop.f32.mrf.mxu1  ;;  %v1013_v31 = vadd.f32 %v2799_v57, %v830_v19 }
 0x12b   : > { %v843_v62 = vpop.f32.mrf.mxu0 }
 0x12c   : > { %v2807_v2 = vpop.f32.mrf.mxu1 }
 0x12d   : > { %v2805_v0 = vpop.f32.mrf.mxu0 }
 0x12e   : > { %v2811_v4 = vpop.f32.mrf.mxu1  ;;  %v865_v5 = vadd.f32 %v2805_v0, %v692_v56  ;;  %v3239_v56 = vld [vmem:[#allocation4_spill] sm:$0xff] }
 0x12f   : > { %v2809_v3 = vpop.f32.mrf.mxu0 }
 0x130   : > { %v2815_v13 = vpop.f32.mrf.mxu1 }
 0x131   : > { %v2813_v10 = vpop.f32.mrf.mxu0  ;;  %3230 = vst [vmem:[#allocation8_spill] sm:$0xff] %v2815_v13 }
 0x132   : > { %v2819_v15 = vpop.f32.mrf.mxu1 }
 0x133   : > { %v2817_v14 = vpop.f32.mrf.mxu0  ;;  %3231 = vst [vmem:[#allocation9_spill] sm:$0xff] %v2819_v15 }
 0x134   : > { %v2823_v41 = vpop.f32.mrf.mxu1 }
 0x135   : > { %v2821_v16 = vpop.f32.mrf.mxu0  ;;  %3233 = vst [vmem:[#allocation11_spill] sm:$0xff] %v2823_v41  ;;  %v823_v41 = vadd.f32 %v2141_v42, %v656_v20  ;;  %v680_v20 = vadd.f32 %v2761_v30, %v2759_v29 }
 0x136   : > { %3232 = vst [vmem:[#allocation10_spill] sm:$0xff] %v2821_v16  ;;  %v2827_v49 = vpop.f32.mrf.mxu1  ;;  %v989_v16 = vadd.f32 %v2164_v33, %v809_v54 }
 0x137   : > { %v2825_v46 = vpop.f32.mrf.mxu0  ;;  %3234 = vst [vmem:[#allocation12_spill] sm:$0xff] %v2827_v49  ;;  %v1005_v22 = vadd.f32 %v2167_v43, %v823_v41  ;;  %v1433_v43 = vld [vmem:[#allocation2 + $0x18] sm:$0xff]  ;;  %v844_v41 = vadd.f32 %v843_v62, %v674_v27 }
 0x138   : > { %v2831_v24 = vpop.f32.mrf.mxu1 }
 0x139   : > { %v2829_v55 = vpop.f32.mrf.mxu0  ;;  %3236 = vst [vmem:[#allocation14_spill] sm:$0xff] %v2831_v24  ;;  %v1029_v44 = vadd.f32 %v2803_v63, %v844_v41  ;;  %v3240_v41 = vld [vmem:[#allocation5_spill] sm:$0xff] }
 0x13a   : > { %3235 = vst [vmem:[#allocation13_spill] sm:$0xff] %v2829_v55  ;;  %v2835_v15 = vpop.f32.mrf.mxu1  ;;  %v1431_v55 = vld [vmem:[#allocation2] sm:$0xff] }
 0x13b   : > { %v2833_v13 = vpop.f32.mrf.mxu0 }
 0x13c   : > { %v2216_v12 = vpop.f32.mrf.mxu1 }
 0x13d   : > { %v2190_v49 = vpop.f32.mrf.mxu0 }
 0x13e   : > { %v1181_v32 = vadd.f32 %v2190_v49, %v989_v16  ;;  %v1336_v18 = vpop.f32.mrf.mxu1  ;;  %v851_v16 = vadd.f32 %v2147_v58, %v680_v20  ;;  %v1432_v49 = vld [vmem:[#allocation2 + $0x58] sm:$0xff]  ;;  %v1053_v20 = vadd.f32 %v2807_v2, %v865_v5 }
 0x13f   : > { %v1174_v24 = vpop.f32.mrf.mxu0 }
 0x140   : > { %v2841_v23 = vadd.f32 %v2216_v12, %v1181_v32  ;;  %v1175_v33 = vadd.f32 %v1174_v24, %v981_v17  ;;  %v2219_v37 = vpop.f32.mrf.mxu1  ;;  %v1037_v36 = vadd.f32 %v2801_v61, %v851_v16  ;;  %v704_v32 = vadd.f32 %v2777_v50, %v2775_v45 }
 0x141   : > { %v2193_v9 = vpop.f32.mrf.mxu0 }
 0x142   : > { %v1447_v38 = vmin.f32 %v1431_v55, %v2841_v23  ;;  %v2846_v42 = vadd.f32 %v1336_v18, %v1175_v33  ;;  %v1193_v47 = vadd.f32 %v2193_v9, %v1005_v22  ;;  %v1348_v24 = vpop.f32.mrf.mxu1  ;;  %v686_v55 = vadd.f32 %v2773_v40, %v2771_v39  ;;  %v1434_v18 = vld [vmem:[#allocation2 + $0x50] sm:$0xff] }
 0x143   : > { %v1186_v51 = vpop.f32.mrf.mxu0  ;;  %v698_v33 = vadd.f32 %v2781_v60, %v2779_v59  ;;  %v879_v63 = vadd.f32 %v2813_v10, %v704_v32 }
 0x144   : > { %1463 = vst [vmem:[#allocation2] sm:$0xff] %v1447_v38  ;;  %v1446_v29 = vmin.f32 %v1430_v26, %v2846_v42  ;;  %v2851_v30 = vadd.f32 %v2219_v37, %v1193_v47  ;;  %v1187_v48 = vadd.f32 %v1186_v51, %v997_v25  ;;  %v2222_v54 = vpop.f32.mrf.mxu1  ;;  %v858_v0 = vadd.f32 %v2809_v3, %v686_v55  ;;  %v1437_v25 = vld [vmem:[#allocation2 + $0x48] sm:$0xff] }
 0x145   : > { %v2196_v53 = vpop.f32.mrf.mxu0  ;;  %v716_v37 = vadd.f32 %v2785_v6, %v2783_v1  ;;  %v872_v19 = vadd.f32 %v2817_v14, %v698_v33  ;;  %v1436_v38 = vld [vmem:[#allocation2 + $0x8] sm:$0xff]  ;;  %v3238_v14 = vld [vmem:[#allocation8_spill] sm:$0xff] }
 0x146   : > { %1462 = vst [vmem:[#allocation2 + $0x30] sm:$0xff] %v1446_v29  ;;  %v1449_v34 = vmin.f32 %v1433_v43, %v2851_v30  ;;  %v2857_v52 = vadd.f32 %v1348_v24, %v1187_v48  ;;  %v1205_v58 = vadd.f32 %v2196_v53, %v1021_v28  ;;  %v1360_v35 = vpop.f32.mrf.mxu1  ;;  %v1045_v2 = vadd.f32 %v2811_v4, %v858_v0  ;;  %v3237_v43 = vld [vmem:[#allocation10_spill] sm:$0xff]  ;;  %v3241_v53 = vld [vmem:[#allocation9_spill] sm:$0xff] }
 0x147   : > { %v1198_v12 = vpop.f32.mrf.mxu0  ;;  %v710_v28 = vadd.f32 %v2789_v8, %v2787_v7  ;;  %v893_v51 = vadd.f32 %v3237_v43, %v716_v37  ;;  %v1439_v24 = vld [vmem:[#allocation2 + $0x20] sm:$0xff]  ;;  %v1069_v16 = vadd.f32 %v3238_v14, %v879_v63 }
 0x148   : > { %1465 = vst [vmem:[#allocation2 + $0x18] sm:$0xff] %v1449_v34  ;;  %v1448_v62 = vmin.f32 %v1432_v49, %v2857_v52  ;;  %v2864_v57 = vadd.f32 %v2222_v54, %v1205_v58  ;;  %v1199_v17 = vadd.f32 %v1198_v12, %v1013_v31  ;;  %v2225_v40 = vpop.f32.mrf.mxu1  ;;  %v728_v49 = vadd.f32 %v3240_v41, %v3239_v56  ;;  %v1438_v31 = vld [vmem:[#allocation2 + $0x40] sm:$0xff]  ;;  %v3243_v12 = vld [vmem:[#allocation7_spill] sm:$0xff] }
 0x149   : > { %v2199_v39 = vpop.f32.mrf.mxu0  ;;  %v1061_v54 = vadd.f32 %v3241_v53, %v872_v19  ;;  %v886_v8 = vadd.f32 %v2825_v46, %v710_v28 }
 0x14a   : > { %1464 = vst [vmem:[#allocation2 + $0x58] sm:$0xff] %v1448_v62  ;;  %v1451_v21 = vmin.f32 %v1435_v11, %v2864_v57  ;;  %v2871_v61 = vadd.f32 %v1360_v35, %v1199_v17  ;;  %v1217_v22 = vadd.f32 %v2199_v39, %v1037_v36  ;;  %v1372_v50 = vpop.f32.mrf.mxu1  ;;  %v3242_v11 = vld [vmem:[#allocation6_spill] sm:$0xff]  ;;  %v3244_v36 = vld [vmem:[#allocation11_spill] sm:$0xff]  ;;  %v1441_v17 = vld [vmem:[#allocation2 + $0x38] sm:$0xff]  ;;  %v1479_v14 = vmin.f32 %v2841_v23, %v2864_v57 }
 0x14b   : > { %v1210_v45 = vpop.f32.mrf.mxu0  ;;  %v722_v35 = vadd.f32 %v3243_v12, %v3242_v11  ;;  %v1085_v62 = vadd.f32 %v3244_v36, %v893_v51 }
 0x14c   : > { %1467 = vst [vmem:[#allocation2 + $0x68] sm:$0xff] %v1451_v21  ;;  %v1450_v26 = vmin.f32 %v1434_v18, %v2871_v61  ;;  %v2878_v3 = vadd.f32 %v2225_v40, %v1217_v22  ;;  %v1211_v9 = vadd.f32 %v1210_v45, %v1029_v44  ;;  %v2228_v60 = vpop.f32.mrf.mxu1  ;;  %v3245_v18 = vld [vmem:[#allocation13_spill] sm:$0xff]  ;;  %v1440_v22 = vld [vmem:[#allocation2 + $0x10] sm:$0xff]  ;;  %v1478_v51 = vmin.f32 %v2846_v42, %v2871_v61 }
 0x14d   : > { %v2202_v59 = vpop.f32.mrf.mxu0  ;;  %v907_v39 = vadd.f32 %v3245_v18, %v728_v49  ;;  %v900_v46 = vadd.f32 %v2833_v13, %v722_v35 }
 0x14e   : > { %1466 = vst [vmem:[#allocation2 + $0x50] sm:$0xff] %v1450_v26  ;;  %v1453_v47 = vmin.f32 %v1437_v25, %v2878_v3  ;;  %v2885_v10 = vadd.f32 %v1372_v50, %v1211_v9  ;;  %v1229_v27 = vadd.f32 %v2202_v59, %v1053_v20  ;;  %v1384_v6 = vpop.f32.mrf.mxu1  ;;  %v3246_v25 = vld [vmem:[#allocation12_spill] sm:$0xff] }
 0x14f   : > { %v1222_v1 = vpop.f32.mrf.mxu0  ;;  %v1077_v45 = vadd.f32 %v3246_v25, %v886_v8  ;;  %v1443_v9 = vld [vmem:[#allocation2 + $0x70] sm:$0xff]  ;;  %v1093_v13 = vadd.f32 %v2835_v15, %v900_v46 }
 0x150   : > { %1469 = vst [vmem:[#allocation2 + $0x48] sm:$0xff] %v1453_v47  ;;  %v1452_v29 = vmin.f32 %v1436_v38, %v2885_v10  ;;  %v1391_v4 = vadd.f32 %v2228_v60, %v1229_v27  ;;  %v1223_v48 = vadd.f32 %v1222_v1, %v1045_v2  ;;  %v2231_v7 = vpop.f32.mrf.mxu1  ;;  %v3247_v38 = vld [vmem:[#allocation14_spill] sm:$0xff]  ;;  %v1480_v15 = vmin.f32 %v2857_v52, %v2885_v10 }
 0x151   : > { %v2205_v34 = vpop.f32.mrf.mxu0  ;;  %v1101_v59 = vadd.f32 %v3247_v38, %v907_v39  ;;  %v1442_v27 = vld [vmem:[#allocation2 + $0x60] sm:$0xff] }
 0x152   : > { %1468 = vst [vmem:[#allocation2 + $0x8] sm:$0xff] %v1452_v29  ;;  %v1455_v58 = vmin.f32 %v1439_v24, %v1391_v4  ;;  %v1385_v55 = vadd.f32 %v1384_v6, %v1223_v48  ;;  %v1241_v5 = vadd.f32 %v2205_v34, %v1069_v16  ;;  %v1396_v44 = vpop.f32.mrf.mxu1  ;;  %v1481_v16 = vmin.f32 %v2851_v30, %v2878_v3  ;;  %v1445_v29 = vld [vmem:[#allocation2 + $0x28] sm:$0xff] }
 0x153   : > { %v1234_v32 = vpop.f32.mrf.mxu0  ;;  %v1483_v49 = vmin.f32 %v1479_v14, %v1391_v4  ;;  %v1495_v4 = vld [vmem:[%s2913_s29] sm:$0xff] }
 0x154   : > { %1471 = vst [vmem:[#allocation2 + $0x20] sm:$0xff] %v1455_v58  ;;  %v1454_v40 = vmin.f32 %v1438_v31, %v1385_v55  ;;  %v1403_v0 = vadd.f32 %v2231_v7, %v1241_v5  ;;  %v1235_v21 = vadd.f32 %v1234_v32, %v1061_v54  ;;  %v2234_v20 = vpop.f32.mrf.mxu1  ;;  %v1482_v56 = vmin.f32 %v1478_v51, %v1385_v55  ;;  %v1444_v31 = vld [vmem:[#allocation2 + $0x78] sm:$0xff] }
 0x155   : > { %v2208_v33 = vpop.f32.mrf.mxu0 }
 0x156   : > { %1470 = vst [vmem:[#allocation2 + $0x40] sm:$0xff] %v1454_v40  ;;  %v1457_v50 = vmin.f32 %v1441_v17, %v1403_v0  ;;  %v1397_v63 = vadd.f32 %v1396_v44, %v1235_v21  ;;  %v1253_v26 = vadd.f32 %v2208_v33, %v1085_v62  ;;  %v1408_v19 = vpop.f32.mrf.mxu1  ;;  %v1485_v53 = vmin.f32 %v1481_v16, %v1403_v0 }
 0x157   : > { %v1246_v37 = vpop.f32.mrf.mxu0 }
 0x158   : > { %1473 = vst [vmem:[#allocation2 + $0x38] sm:$0xff] %v1457_v50  ;;  %v1456_v60 = vmin.f32 %v1440_v22, %v1397_v63  ;;  %v1415_v2 = vadd.f32 %v2234_v20, %v1253_v26  ;;  %v1247_v47 = vadd.f32 %v1246_v37, %v1077_v45  ;;  %v2237_v43 = vpop.f32.mrf.mxu1  ;;  %v1484_v34 = vmin.f32 %v1480_v15, %v1397_v63 }
 0x159   : > { %v2211_v28 = vpop.f32.mrf.mxu0 }
 0x15a   : > { %1472 = vst [vmem:[#allocation2 + $0x10] sm:$0xff] %v1456_v60  ;;  %v1459_v24 = vmin.f32 %v1443_v9, %v1415_v2  ;;  %v1409_v1 = vadd.f32 %v1408_v19, %v1247_v47  ;;  %v1265_v6 = vadd.f32 %v2211_v28, %v1101_v59  ;;  %v1420_v54 = vpop.f32.mrf.mxu1  ;;  %v1487_v3 = vmin.f32 %v1483_v49, %v1415_v2 }
 0x15b   : > { %v1258_v48 = vpop.f32.mrf.mxu0 }
 0x15c   : > { %1475 = vst [vmem:[#allocation2 + $0x70] sm:$0xff] %v1459_v24  ;;  %v1458_v41 = vmin.f32 %v1442_v27, %v1409_v1  ;;  %v1427_v42 = vadd.f32 %v2237_v43, %v1265_v6  ;;  %v1259_v61 = vadd.f32 %v1258_v48, %v1093_v13  ;;  %v1486_v23 = vmin.f32 %v1482_v56, %v1409_v1 }
 0x15e   : > { %1474 = vst [vmem:[#allocation2 + $0x60] sm:$0xff] %v1458_v41  ;;  %v1461_v57 = vmin.f32 %v1445_v29, %v1427_v42  ;;  %v1421_v30 = vadd.f32 %v1420_v54, %v1259_v61  ;;  %v1489_v52 = vmin.f32 %v1485_v53, %v1427_v42  ;;  %v1490_v8 = vmin.f32 %v1486_v23, %v1487_v3 }
 0x160   : > { %1477 = vst [vmem:[#allocation2 + $0x28] sm:$0xff] %v1461_v57  ;;  %v1460_v10 = vmin.f32 %v1444_v31, %v1421_v30  ;;  %v1488_v7 = vmin.f32 %v1484_v34, %v1421_v30 }
 0x162   : > { %1476 = vst [vmem:[#allocation2 + $0x78] sm:$0xff] %v1460_v10  ;;  %v1491_v58 = vmin.f32 %v1488_v7, %v1489_v52 }
 0x164   : > { %v1492_v55 = vmin.f32 %v1490_v8, %v1491_v58  ;;  %1501 = sbr.rel (%p1976_p11) target bundleno = 557 (0x22d), region = 40 }
 0x166   : > { %v1496_v5 = vmin.f32 %v1495_v4, %v1492_v55 }
 0x168   : > { %1497 = vst [vmem:[%s2913_s29] sm:$0xff] %v1496_v5 }
 0x169   : > { %v1504_v11 = vld [vmem:[#allocation2 + $0x58] sm:$0xff]  ;;  %v1502_v12 = vld [vmem:[#allocation2 + $0x30] sm:$0xff]  ;;  %v1503_v36 = vld [vmem:[#allocation2] sm:$0xff]  ;;  %v1694_v63 = vlaneseq  ;;  %vm1705_vm1 = vcmask 130112   ;;  %vm1712_vm6 = vcmask 195712   ;;  %vm1719_vm10 = vcmask 261312  }
 0x16a   : > { %1522 = vmin.xlane.f32.xlu1 %v1504_v11  ;;  %1518 = vmin.xlane.f32.xlu0 %v1502_v12  ;;  %v1505_v35 = vld [vmem:[#allocation2 + $0x18] sm:$0xff]  ;;  %v1507_v62 = vld [vmem:[#allocation2 + $0x68] sm:$0xff]  ;;  %v1506_v17 = vld [vmem:[#allocation2 + $0x50] sm:$0xff]  ;;  %vm1726_vm15 = vcmask 326912  }
 0x16b   : > { %v1509_v32 = vld [vmem:[#allocation2 + $0x48] sm:$0xff]  ;;  %v1511_v18 = vld [vmem:[#allocation2 + $0x20] sm:$0xff]  ;;  %v1513_v40 = vld [vmem:[#allocation2 + $0x38] sm:$0xff]  ;;  %v2928_v38 = vand.u32 127, %v1694_v63  ;;  %v2936_v13 = vshrl.u32 %v1694_v63, 7 }
 0x16c   : > { %v1508_v44 = vld [vmem:[#allocation2 + $0x8] sm:$0xff]  ;;  %v1510_v39 = vld [vmem:[#allocation2 + $0x40] sm:$0xff]  ;;  %v1512_v0 = vld [vmem:[#allocation2 + $0x10] sm:$0xff] }
 0x16d   : > { %v1515_v21 = vld [vmem:[#allocation2 + $0x70] sm:$0xff]  ;;  %v1514_v46 = vld [vmem:[#allocation2 + $0x60] sm:$0xff]  ;;  %v1517_v22 = vld [vmem:[#allocation2 + $0x28] sm:$0xff]  ;;  %v2939_v27 = vadd.s32 4294967280, %v2928_v38  ;;  %v2943_v28 = vadd.s32 4294967272, %v2928_v38  ;;  %v2946_v43 = vadd.s32 4294967288, %v2928_v38  ;;  %v1698_v49 = vsub.s32 %v2928_v38, %v2936_v13 }
 0x16e   : > { %1524 = vmin.xlane.f32.xlu1 %v1505_v35  ;;  %1520 = vmin.xlane.f32.xlu0 %v1503_v36  ;;  %v1516_v33 = vld [vmem:[#allocation2 + $0x78] sm:$0xff]  ;;  %v2950_v1 = vadd.s32 4294967256, %v2928_v38  ;;  %v2953_v6 = vadd.s32 4294967264, %v2928_v38  ;;  %v2962_v29 = vadd.s32 4294967240, %v2928_v38  ;;  %v2965_v48 = vadd.s32 4294967248, %v2928_v38 }
 0x16f   : > { %v1710_v15 = vsub.s32 %v2939_v27, %v2936_v13  ;;  %v2968_v56 = vadd.s32 4294967224, %v2928_v38  ;;  %v2972_v41 = vadd.s32 4294967232, %v2928_v38  ;;  %v2975_v42 = vadd.s32 4294967208, %v2928_v38 }
 0x170   : > { %v2978_v61 = vadd.s32 4294967216, %v2928_v38  ;;  %v1717_v53 = vsub.s32 %v2943_v28, %v2936_v13  ;;  %v1703_v54 = vsub.s32 %v2946_v43, %v2936_v13  ;;  %v1731_v57 = vsub.s32 %v2950_v1, %v2936_v13 }
 0x171   : > { %v1724_v30 = vsub.s32 %v2953_v6, %v2936_v13  ;;  %v1745_v8 = vsub.s32 %v2962_v29, %v2936_v13  ;;  %v1738_v58 = vsub.s32 %v2965_v48, %v2936_v13  ;;  %v1759_v4 = vsub.s32 %v2968_v56, %v2936_v13 }
 0x172   : > { %1528 = vmin.xlane.f32.xlu1 %v1507_v62  ;;  %1526 = vmin.xlane.f32.xlu0 %v1506_v17  ;;  %v1752_v55 = vsub.s32 %v2972_v41, %v2936_v13  ;;  %v1773_v5 = vsub.s32 %v2975_v42, %v2936_v13  ;;  %v1766_v11 = vsub.s32 %v2978_v61, %v2936_v13  ;;  %v3012_v62 = vadd.s32 4294967192, %v2928_v38 }
 0x173   : > { %v3015_v17 = vadd.s32 4294967200, %v2928_v38  ;;  %v1798_v29 = vadd.s32 4294967176, %v2928_v38 }
 0x175   : > { %v1801_v56 = vsub.s32 %v1798_v29, %v2936_v13 }
 0x176   : > { %1532 = vmin.xlane.f32.xlu1 %v1509_v32  ;;  %1530 = vmin.xlane.f32.xlu0 %v1508_v44 }
 0x17a   : > { %1536 = vmin.xlane.f32.xlu1 %v1511_v18  ;;  %1534 = vmin.xlane.f32.xlu0 %v1510_v39 }
 0x17e   : > { %1540 = vmin.xlane.f32.xlu1 %v1513_v40  ;;  %1538 = vmin.xlane.f32.xlu0 %v1512_v0 }
 0x182   : > { %1544 = vmin.xlane.f32.xlu1 %v1515_v21  ;;  %1542 = vmin.xlane.f32.xlu0 %v1514_v46 }
 0x186   : > { %1548 = vmin.xlane.f32.xlu1 %v1517_v22  ;;  %1546 = vmin.xlane.f32.xlu0 %v1516_v33 }
 0x1f3   : > { %v1523_v20 = vpop.xlane.xlu1 %1522  ;;  %v1519_v25 = vpop.xlane.xlu0 %1518 }
 0x1f4   : > { %v2918_v45 = vmax.f32 %v1523_v20, 0.0  ;;  %v2920_v50 = vmax.f32 %v1519_v25, 0.0 }
 0x1f6   : > { %2296 = vrsqrt.f32 %v2920_v50  ;;  %vm1582_vm2 = vcmp.eq.f32.partialorder %v2918_v45, inf  ;;  %vm1584_vm3 = vcmp.eq.f32.partialorder %v2918_v45, 0.0  ;;  %v1585_v18 = vand.u32 2147483648, %v2918_v45 }
 0x1f7   : > { %v1525_v26 = vpop.xlane.xlu1 %1524  ;;  %v1521_v9 = vpop.xlane.xlu0 %1520  ;;  %2298 = vrsqrt.f32 %v2918_v45  ;;  %vm1568_vm4 = vcmp.eq.f32.partialorder %v2920_v50, inf  ;;  %vm1570_vm5 = vcmp.eq.f32.partialorder %v2920_v50, 0.0  ;;  %v1571_v40 = vand.u32 2147483648, %v2920_v50 }
 0x1f8   : > { %v2924_v37 = vmax.f32 %v1525_v26, 0.0  ;;  %v2926_v19 = vmax.f32 %v1521_v9, 0.0 }
 0x1fa   : > { %2300 = vrsqrt.f32 %v2924_v37  ;;  %vm1575_vm7 = vcmp.eq.f32.partialorder %v2926_v19, inf  ;;  %v1578_v21 = vand.u32 2147483648, %v2926_v19  ;;  %vm1589_vm8 = vcmp.eq.f32.partialorder %v2924_v37, inf }
 0x1fb   : > { %2302 = vrsqrt.f32 %v2926_v19  ;;  %v1529_v59 = vpop.xlane.xlu1 %1528  ;;  %v1527_v60 = vpop.xlane.xlu0 %1526  ;;  %vm1577_vm9 = vcmp.eq.f32.partialorder %v2926_v19, 0.0  ;;  %vm1591_vm11 = vcmp.eq.f32.partialorder %v2924_v37, 0.0 }
 0x1fc   : > { %v2932_v2 = vmax.f32 %v1529_v59, 0.0  ;;  %v2934_v47 = vmax.f32 %v1527_v60, 0.0  ;;  %v1592_v60 = vand.u32 2147483648, %v2924_v37 }
 0x1fe   : > { %2304 = vrsqrt.f32 %v2932_v2  ;;  %vm1603_vm12 = vcmp.eq.f32.partialorder %v2932_v2, inf  ;;  %vm1605_vm13 = vcmp.eq.f32.partialorder %v2932_v2, 0.0  ;;  %vm1596_vm14 = vcmp.eq.f32.partialorder %v2934_v47, inf }
 0x1ff   : > { %2306 = vrsqrt.f32 %v2934_v47  ;;  %v1533_v51 = vpop.xlane.xlu1 %1532  ;;  %v1531_v24 = vpop.xlane.xlu0 %1530  ;;  %vm1598_vm0 = vcmp.eq.f32.partialorder %v2934_v47, 0.0 }
 0x200   : > { %v2955_v14 = vmax.f32 %v1533_v51, 0.0  ;;  %v2957_v16 = vmax.f32 %v1531_v24, 0.0 }
 0x202   : > { %2308 = vrsqrt.f32 %v2955_v14  ;;  %v1620_v6 = vand.u32 2147483648, %v2955_v14 }
 0x203   : > { %2310 = vrsqrt.f32 %v2957_v16  ;;  %v1537_v31 = vpop.xlane.xlu1 %1536  ;;  %v1535_v34 = vpop.xlane.xlu0 %1534 }
 0x204   : > { %v2297_v23 = vpop.eup %2296  ;;  %v2991_v3 = vmax.f32 %v1537_v31, 0.0  ;;  %v2993_v52 = vmax.f32 %v1535_v34, 0.0 }
 0x205   : > { %v2299_v10 = vpop.eup %2298  ;;  %v1567_v7 = vmul.f32 %v2297_v23, %v2920_v50 }
 0x206   : > { %2312 = vrsqrt.f32 %v2991_v3  ;;  %v1581_v44 = vmul.f32 %v2299_v10, %v2918_v45 }
 0x207   : > { %v2301_v12 = vpop.eup %2300  ;;  %2314 = vrsqrt.f32 %v2993_v52  ;;  %v1541_v35 = vpop.xlane.xlu1 %1540  ;;  %v1569_v39 = vsel %vm1568_vm4, %v2920_v50, %v1567_v7  ;;  %v1606_v7 = vand.u32 2147483648, %v2932_v2  ;;  %vm1733_vm4 = vcmask 392512  }
 0x208   : > { %v1539_v36 = vpop.xlane.xlu0 %1538  ;;  %v2303_v32 = vpop.eup %2302  ;;  %v3027_v46 = vmax.f32 %v1541_v35, 0.0  ;;  %v1588_v20 = vmul.f32 %v2301_v12, %v2924_v37  ;;  %v1583_v63 = vsel %vm1582_vm2, %v2918_v45, %v1581_v44  ;;  %v1572_v26 = vsel %vm1570_vm5, %v1571_v40, %v1569_v39 }
 0x209   : > { %v1574_v0 = vmul.f32 %v2303_v32, %v2926_v19  ;;  %v3029_v22 = vmax.f32 %v1539_v36, 0.0  ;;  %v1586_v31 = vsel %vm1584_vm3, %v1585_v18, %v1583_v63  ;;  %v1699_v34 = vrot.slane %v1572_v26, %v1698_v49 }
 0x20a   : > { %2316 = vrsqrt.f32 %v3027_v46  ;;  %v1599_v45 = vand.u32 2147483648, %v2934_v47  ;;  %vm1617_vm2 = vcmp.eq.f32.partialorder %v2955_v14, inf  ;;  %vm1610_vm3 = vcmp.eq.f32.partialorder %v2957_v16, inf }
 0x20b   : > { %v2305_v33 = vpop.eup %2304  ;;  %v1576_v25 = vsel %vm1575_vm7, %v2926_v19, %v1574_v0  ;;  %v1545_v59 = vpop.xlane.xlu1 %1544  ;;  %2318 = vrsqrt.f32 %v3029_v22  ;;  %v1711_v36 = vrot.slane %v1586_v31, %v1710_v15  ;;  %vm1612_vm5 = vcmp.eq.f32.partialorder %v2957_v16, 0.0 }
 0x20c   : > { %v2307_v50 = vpop.eup %2306  ;;  %v1579_v9 = vsel %vm1577_vm9, %v1578_v21, %v1576_v25  ;;  %v1543_v24 = vpop.xlane.xlu0 %1542  ;;  %v1602_v23 = vmul.f32 %v2305_v33, %v2932_v2  ;;  %v3068_v44 = vmax.f32 %v1545_v59, 0.0  ;;  %vm1624_vm7 = vcmp.eq.f32.partialorder %v2993_v52, inf }
 0x20d   : > { %v1704_v43 = vrot.slane %v1579_v9, %v1703_v54  ;;  %v1595_v51 = vmul.f32 %v2307_v50, %v2934_v47  ;;  %v1590_v54 = vsel %vm1589_vm8, %v2924_v37, %v1588_v20  ;;  %v3070_v18 = vmax.f32 %v1543_v24, 0.0 }
 0x20e   : > { %v1593_v32 = vsel %vm1591_vm11, %v1592_v60, %v1590_v54  ;;  %v1604_v40 = vsel %vm1603_vm12, %v2932_v2, %v1602_v23  ;;  %v1613_v20 = vand.u32 2147483648, %v2957_v16  ;;  %2320 = vrsqrt.f32 %v3068_v44 }
 0x20f   : > { %v2309_v19 = vpop.eup %2308  ;;  %v1597_v12 = vsel %vm1596_vm14, %v2934_v47, %v1595_v51  ;;  %v1706_v35 = vsel %vm1705_vm1, %v1704_v43, %v1699_v34  ;;  %v1549_v47 = vpop.xlane.xlu1 %1548  ;;  %vm1740_vm1 = vcmask 458112   ;;  %v1718_v25 = vrot.slane %v1593_v32, %v1717_v53 }
 0x210   : > { %v2311_v10 = vpop.eup %2310  ;;  %v1600_v0 = vsel %vm1598_vm0, %v1599_v45, %v1597_v12  ;;  %v1616_v21 = vmul.f32 %v2309_v19, %v2955_v14  ;;  %v1547_v27 = vpop.xlane.xlu0 %1546  ;;  %v1713_v15 = vsel %vm1712_vm6, %v1711_v36, %v1706_v35  ;;  %v3088_v63 = vmax.f32 %v1549_v47, 0.0 }
 0x211   : > { %v1609_v49 = vmul.f32 %v2311_v10, %v2957_v16  ;;  %v1607_v26 = vsel %vm1605_vm13, %v1606_v7, %v1604_v40  ;;  %v1725_v9 = vrot.slane %v1600_v0, %v1724_v30  ;;  %vm1747_vm6 = vcmask 523712  }
 0x212   : > { %2322 = vrsqrt.f32 %v3070_v18  ;;  %v3096_v59 = vmax.f32 %v1547_v27, 0.0  ;;  %v1720_v28 = vsel %vm1719_vm10, %v1718_v25, %v1713_v15  ;;  %v1618_v53 = vsel %vm1617_vm2, %v2955_v14, %v1616_v21 }
 0x213   : > { %v2313_v39 = vpop.eup %2312  ;;  %v1611_v33 = vsel %vm1610_vm3, %v2957_v16, %v1609_v49  ;;  %vm1754_vm8 = vcmask 589312   ;;  %vm1619_vm9 = vcmp.eq.f32.partialorder %v2955_v14, 0.0  ;;  %vm1631_vm11 = vcmp.eq.f32.partialorder %v2991_v3, inf }
 0x214   : > { %v2315_v37 = vpop.eup %2314  ;;  %v1614_v60 = vsel %vm1612_vm5, %v1613_v20, %v1611_v33  ;;  %v1630_v2 = vmul.f32 %v2313_v39, %v2991_v3  ;;  %v1732_v51 = vrot.slane %v1607_v26, %v1731_v57  ;;  %vm1626_vm10 = vcmp.eq.f32.partialorder %v2993_v52, 0.0 }
 0x215   : > { %v1623_v50 = vmul.f32 %v2315_v37, %v2993_v52  ;;  %v1627_v16 = vand.u32 2147483648, %v2993_v52  ;;  %2324 = vrsqrt.f32 %v3088_v63  ;;  %v1727_v24 = vsel %vm1726_vm15, %v1725_v9, %v1720_v28 }
 0x216   : > { %v1621_v14 = vsel %vm1619_vm9, %v1620_v6, %v1618_v53  ;;  %v1739_v19 = vrot.slane %v1614_v60, %v1738_v58  ;;  %vm1761_vm12 = vcmask 654912   ;;  %2326 = vrsqrt.f32 %v3096_v59 }
 0x217   : > { %v1625_v30 = vsel %vm1624_vm7, %v2993_v52, %v1623_v50  ;;  %v2317_v43 = vpop.eup %2316  ;;  %v1632_v1 = vsel %vm1631_vm11, %v2991_v3, %v1630_v2  ;;  %vm1633_vm13 = vcmp.eq.f32.partialorder %v2991_v3, 0.0  ;;  %vm1768_vm14 = vcmask 720512  }
 0x218   : > { %v2319_v31 = vpop.eup %2318  ;;  %v1628_v57 = vsel %vm1626_vm10, %v1627_v16, %v1625_v30  ;;  %v1644_v52 = vmul.f32 %v2317_v43, %v3027_v46  ;;  %v1634_v34 = vand.u32 2147483648, %v2991_v3  ;;  %vm1645_vm15 = vcmp.eq.f32.partialorder %v3027_v46, inf }
 0x219   : > { %v1637_v54 = vmul.f32 %v2319_v31, %v3029_v22  ;;  %vm1638_vm0 = vcmp.eq.f32.partialorder %v3029_v22, inf  ;;  %v1746_v48 = vrot.slane %v1621_v14, %v1745_v8  ;;  %v1734_v58 = vsel %vm1733_vm4, %v1732_v51, %v1727_v24 }
 0x21a   : > { %vm1640_vm2 = vcmp.eq.f32.partialorder %v3029_v22, 0.0  ;;  %v1641_v23 = vand.u32 2147483648, %v3029_v22  ;;  %v1741_v10 = vsel %vm1740_vm1, %v1739_v19, %v1734_v58  ;;  %v1635_v7 = vsel %vm1633_vm13, %v1634_v34, %v1632_v1 }
 0x21b   : > { %v1753_v3 = vrot.slane %v1628_v57, %v1752_v55  ;;  %v1639_v12 = vsel %vm1638_vm0, %v3029_v22, %v1637_v54  ;;  %v1646_v45 = vsel %vm1645_vm15, %v3027_v46, %v1644_v52  ;;  %v1791_v8 = vadd.s32 4294967184, %v2928_v38  ;;  %v2321_v22 = vpop.eup %2320 }
 0x21c   : > { %v1642_v35 = vsel %vm1640_vm2, %v1641_v23, %v1639_v12  ;;  %v1648_v49 = vand.u32 2147483648, %v3027_v46  ;;  %v1787_v36 = vsub.s32 %v3012_v62, %v2936_v13  ;;  %vm1775_vm3 = vcmask 786112  }
 0x21d   : > { %v1780_v32 = vsub.s32 %v3015_v17, %v2936_v13  ;;  %v1760_v41 = vrot.slane %v1635_v7, %v1759_v4  ;;  %v1748_v55 = vsel %vm1747_vm6, %v1746_v48, %v1741_v10  ;;  %vm1647_vm4 = vcmp.eq.f32.partialorder %v3027_v46, 0.0 }
 0x21e   : > { %vm1782_vm1 = vcmask 851712   ;;  %v1755_v38 = vsel %vm1754_vm8, %v1753_v3, %v1748_v55  ;;  %v1649_v47 = vsel %vm1647_vm4, %v1648_v49, %v1646_v45  ;;  %v1767_v62 = vrot.slane %v1642_v35, %v1766_v11 }
 0x21f   : > { %vm1789_vm5 = vcmask 917312   ;;  %v2323_v39 = vpop.eup %2322  ;;  %v1658_v17 = vmul.f32 %v2321_v22, %v3068_v44  ;;  %vm1659_vm7 = vcmp.eq.f32.partialorder %v3068_v44, inf  ;;  %v1794_v4 = vsub.s32 %v1791_v8, %v2936_v13 }
 0x220   : > { %vm1661_vm6 = vcmp.eq.f32.partialorder %v3068_v44, 0.0  ;;  %v1662_v46 = vand.u32 2147483648, %v3068_v44  ;;  %v1651_v40 = vmul.f32 %v2323_v39, %v3070_v18  ;;  %vm1652_vm8 = vcmp.eq.f32.partialorder %v3070_v18, inf }
 0x221   : > { %v1774_v61 = vrot.slane %v1649_v47, %v1773_v5  ;;  %v1762_v11 = vsel %vm1761_vm12, %v1760_v41, %v1755_v38  ;;  %v1660_v0 = vsel %vm1659_vm7, %v3068_v44, %v1658_v17  ;;  %v1655_v21 = vand.u32 2147483648, %v3070_v18 }
 0x222   : > { %v2325_v27 = vpop.eup %2324  ;;  %v1769_v37 = vsel %vm1768_vm14, %v1767_v62, %v1762_v11  ;;  %v1663_v15 = vsel %vm1661_vm6, %v1662_v46, %v1660_v0  ;;  %v1653_v33 = vsel %vm1652_vm8, %v3070_v18, %v1651_v40  ;;  %vm1654_vm9 = vcmp.eq.f32.partialorder %v3070_v18, 0.0 }
 0x223   : > { %v2327_v20 = vpop.eup %2326  ;;  %v1656_v25 = vsel %vm1654_vm9, %v1655_v21, %v1653_v33  ;;  %v1672_v50 = vmul.f32 %v2325_v27, %v3088_v63  ;;  %vm1673_vm11 = vcmp.eq.f32.partialorder %v3088_v63, inf  ;;  %vm1675_vm10 = vcmp.eq.f32.partialorder %v3088_v63, 0.0 }
 0x224   : > { %v1781_v13 = vrot.slane %v1656_v25, %v1780_v32  ;;  %v1676_v42 = vand.u32 2147483648, %v3088_v63  ;;  %v1665_v5 = vmul.f32 %v2327_v20, %v3096_v59  ;;  %vm1666_vm12 = vcmp.eq.f32.partialorder %v3096_v59, inf }
 0x225   : > { %v1788_v44 = vrot.slane %v1663_v15, %v1787_v36  ;;  %v1776_v18 = vsel %vm1775_vm3, %v1774_v61, %v1769_v37  ;;  %v1674_v26 = vsel %vm1673_vm11, %v3088_v63, %v1672_v50  ;;  %v1669_v9 = vand.u32 2147483648, %v3096_v59 }
 0x226   : > { %v1783_v28 = vsel %vm1782_vm1, %v1781_v13, %v1776_v18  ;;  %v1677_v53 = vsel %vm1675_vm10, %v1676_v42, %v1674_v26  ;;  %v1667_v60 = vsel %vm1666_vm12, %v3096_v59, %v1665_v5  ;;  %vm1668_vm13 = vcmp.eq.f32.partialorder %v3096_v59, 0.0 }
 0x227   : > { %v1802_v2 = vrot.slane %v1677_v53, %v1801_v56  ;;  %vm1796_vm14 = vcmask 982912   ;;  %v1670_v6 = vsel %vm1668_vm13, %v1669_v9, %v1667_v60  ;;  %vm1803_vm15 = vcmask 1048512  }
 0x228   : > { %v1795_v30 = vrot.slane %v1670_v6, %v1794_v4  ;;  %v1790_v43 = vsel %vm1789_vm5, %v1788_v44, %v1783_v28 }
 0x22a   : > { %v1797_v63 = vsel %vm1796_vm14, %v1795_v30, %v1790_v43 }
 0x22b   : > { %v1804_v51 = vsel %vm1803_vm15, %v1802_v2, %v1797_v63 }
 0x22c   : > { %1807 = vst [vmem:[%s1806_s6] sm:$0x1] %v1804_v51 }
 0x22d PF: > { %p1977_p12 = scmp.ne.s32.totalorder %s2364_s13, 1 }
 0x22e   : > { %s1827_s7 = scalar_lea.vmem (!%p1977_p12), %s245_s5, %s2360_s12 }
 0x22f   : > { %1811 = sbr.rel (%p1977_p12) target bundleno = 598 (0x256), region = 44 }
 0x234   : > { %v1812_v59 = vld [vmem:[%s2913_s29] sm:$0xff] }
 0x235   : > { %v1813_v16 = vrot.slane %v1812_v59, 4 }
 0x237   : > { %v1814_v24 = vmin.f32 %v1812_v59, %v1813_v16 }
 0x239   : > { %v1815_v14 = vrot.slane %v1814_v24, 2 }
 0x23b   : > { %v1816_v19 = vmin.f32 %v1814_v24, %v1815_v14 }
 0x23d   : > { %v1817_v31 = vrot.slane %v1816_v19, 1 }
 0x23f   : > { %v1818_v1 = vmin.f32 %v1816_v19, %v1817_v31 }
 0x241   : > { %v1819_v57 = vmax.f32 %v1818_v1, 0.0 }
 0x243   : > { %2328 = vrsqrt.f32 %v1819_v57  ;;  %vm1822_vm0 = vcmp.eq.f32.partialorder %v1819_v57, inf  ;;  %v1825_v34 = vand.u32 2147483648, %v1819_v57  ;;  %vm1824_vm2 = vcmp.eq.f32.partialorder %v1819_v57, 0.0 }
 0x250   : > { %v2329_v52 = vpop.eup %2328 }
 0x251   : > { %v1821_v54 = vmul.f32 %v2329_v52, %v1819_v57 }
 0x253   : > { %v1823_v48 = vsel %vm1822_vm0, %v1819_v57, %v1821_v54 }
 0x254   : > { %v1826_v58 = vsel %vm1824_vm2, %v1825_v34, %v1823_v48 }
 0x255   : > { %1828 = vst [vmem:[%s1827_s7] sm:$0x1] %v1826_v58 }
 0x256 PF: > { %s14_s18 = sadd.s32 1, %s2384_s18   ;;  %s3248_s12 = smov %s2372_s15 }
 0x257   : > { %p11_p13 = scmp.ge.s32.totalorder %s14_s18, 10   ;;  %s3249_s13 = smov %s2376_s16 }
 0x258   : > { %s3250_s14 = smov %s2380_s17  ;;  %s3251_s15 = smov %s3255_s19 }
 0x259   : > { %s3252_s16 = smov %s3259_s20  ;;  %s3253_s17 = smov %s3263_s21 }
 0x25a   :  { %13 = sbr.rel (!%p11_p13) target bundleno = 4 (0x4), region = 93 }

</bundles_post_ra>
